<compile_context>
chip_gen: v5e
topology: v5e:2x2
jax: 0.10.0
libtpu: 0.0.40
codegen_flags: <defaults>
</compile_context>

<pallas_src>
import functools

import jax
import jax.numpy as jnp
from jax.experimental import pallas as pl
from jax.experimental.pallas import tpu as pltpu


def _layernorm_kernel(x_ref, gamma_ref, beta_ref, o_ref, *, eps, d_model, d_pad):
    # x_ref: (tile_rows, d_pad); gamma_ref/beta_ref: (1, d_pad)
    x = x_ref[...].astype(jnp.float32)

    inv_n = jnp.float32(1.0 / d_model)
    # Unbiased variance divisor (torch.var default). d_model==1 -> torch gives
    # NaN/inf; here it degenerates to beta (minor, documented divergence).
    inv_nm1 = jnp.float32(1.0 / (d_model - 1)) if d_model > 1 else jnp.float32(0.0)

    # Pass 1: mean. Padded lanes are zero in HBM, so no mask is needed here.
    mean = jnp.sum(x, axis=-1, keepdims=True) * inv_n

    # Pass 2: centered sum of squares. Padded lanes would contribute
    # (0 - mean)^2, so mask them out when the feature dim was padded.
    xc = x - mean
    if d_pad != d_model:
        col = jax.lax.broadcasted_iota(jnp.int32, x.shape, dimension=1)
        xc = jnp.where(col < d_model, xc, jnp.float32(0.0))
    var = jnp.sum(xc * xc, axis=-1, keepdims=True) * inv_nm1

    inv_std = jax.lax.rsqrt(var + jnp.float32(eps))

    gamma = gamma_ref[...].astype(jnp.float32)
    beta = beta_ref[...].astype(jnp.float32)
    o_ref[...] = (gamma * (xc * inv_std) + beta).astype(o_ref.dtype)


def _sublane_for_itemsize(itemsize):
    # Sublane packing: f32 -> 8 rows/vreg, bf16 -> 16, int8/fp8 -> 32.
    return {4: 8, 2: 16, 1: 32}.get(int(itemsize), 8)


def _round_up(a, b):
    return ((a + b - 1) // b) * b


def layer_norm(x, gamma, beta, *, eps=1e-12, tile_rows=None):
    """LayerNorm over the last axis of x. gamma/beta have shape (d_model,)."""
    orig_shape = x.shape
    d_model = int(orig_shape[-1])
    rows = 1
    for s in orig_shape[:-1]:
        rows *= int(s)
    rows = max(rows, 1)
    x2d = x.reshape(rows, d_model)

    # Lane-dense layout: pad feature dim to a multiple of 128 (zeros) so all
    # stores are unmasked full-lane vst. No-op for real transformer d_model.
    d_pad = _round_up(d_model, 128)
    if d_pad != d_model:
        x2d = jnp.pad(x2d, ((0, 0), (0, d_pad - d_model)))
        gamma_p = jnp.pad(gamma.reshape(-1), (0, d_pad - d_model))
        beta_p = jnp.pad(beta.reshape(-1), (0, d_pad - d_model))
    else:
        gamma_p = gamma.reshape(-1)
        beta_p = beta.reshape(-1)
    gamma2d = gamma_p.reshape(1, d_pad)
    beta2d = beta_p.reshape(1, d_pad)

    itemsize = jnp.dtype(x.dtype).itemsize
    sub = _sublane_for_itemsize(itemsize)

    # Generation-aware physical VMEM (v5e/v6e: 128 MiB, v7x: 64 MiB per TC).
    try:
        vmem_cap = int(pltpu.get_tpu_info().vmem_capacity_bytes)
    except Exception:
        vmem_cap = 64 * 1024 * 1024  # conservative fallback (v7x-sized)

    row_bytes = d_pad * itemsize
    total_bytes = rows * row_bytes
    user_tile = tile_rows is not None

    if not user_tile:
        # v7x (small VMEM, 3.2 TB/s HBM) wants ~8 MiB tiles to keep the fixed
        # ~0.35us/step overhead <5% of DMA time; v5e/v6e are at roofline by
        # 2-4 MiB, so keep tiles small there and save VMEM.
        tile_cap_bytes = (8 << 20) if vmem_cap <= (64 << 20) else (4 << 20)
        rows_by_size = max(1, tile_cap_bytes // max(row_bytes, 1))
        # VMEM per tile-row: double-buffered in+out I/O plus ~2 f32 upcast
        # temporaries that Mosaic allocates internally (not counted by I/O).
        bytes_per_row = 2 * 2 * row_bytes + 2 * d_pad * 4
        rows_by_vmem = max(1, (vmem_cap * 8 // 10) // bytes_per_row)
        tile_rows = min(rows_by_size, rows_by_vmem)

    if user_tile:
        tile_rows = max(1, min(int(tile_rows), rows))
        if tile_rows < rows:
            tile_rows = max(sub, (tile_rows // sub) * sub)
        grid = pl.cdiv(rows, tile_rows)
    else:
        tile_rows = max(sub, (int(tile_rows) // sub) * sub)
        tiny = total_bytes < (1 << 20)
        if tiny or rows <= sub:
            # Sub-MiB input: one block covering all rows (full-dim block
            # shapes are exempt from the (8,128) divisibility rule); the
            # pipeline/megacore machinery buys nothing at this size.
            tile_rows = rows
            grid = 1
        else:
            # Keep at least ~4 grid steps so both v7x TensorCores stay busy
            # and input DMA overlaps compute; Pallas masks the ragged edge.
            tile_rows = min(tile_rows, max(sub, _round_up(pl.cdiv(rows, 4), sub)))
            grid = pl.cdiv(rows, tile_rows)
            if grid > 1 and grid % 2 == 1:
                # Even step count -> balanced split across v7x's two TCs.
                cand = max(sub, _round_up(pl.cdiv(rows, grid + 1), sub))
                if pl.cdiv(rows, cand) % 2 == 0:
                    tile_rows = cand
                    grid = pl.cdiv(rows, tile_rows)

    # Explicit scoped-VMEM budget: double-buffered in+out tiles, ~2 f32
    # upcast temporaries, gamma/beta, headroom; capped at 80% of physical.
    need = (2 * 2 * tile_rows * row_bytes       # double-buffered in + out
            + 2 * tile_rows * d_pad * 4         # f32 upcast temporaries
            + 2 * 2 * d_pad * 4                 # gamma/beta (double-buffered)
            + (2 << 20))                        # headroom
    vmem_limit = int(min(vmem_cap * 8 // 10, max(need, 32 << 20)))

    kernel = functools.partial(_layernorm_kernel, eps=eps,
                               d_model=d_model, d_pad=d_pad)

    out2d = pl.pallas_call(
        kernel,
        out_shape=jax.ShapeDtypeStruct((rows, d_pad), x.dtype),
        grid_spec=pltpu.PrefetchScalarGridSpec(
            num_scalar_prefetch=0,
            grid=(grid,),
            in_specs=[
                pl.BlockSpec((tile_rows, d_pad), lambda i: (i, 0)),
                pl.BlockSpec((1, d_pad), lambda i: (0, 0)),
                pl.BlockSpec((1, d_pad), lambda i: (0, 0)),
            ],
            out_specs=pl.BlockSpec((tile_rows, d_pad), lambda i: (i, 0)),
        ),
        compiler_params=pltpu.CompilerParams(
            dimension_semantics=("parallel",),
            vmem_limit_bytes=vmem_limit,
        ),
    )(x2d, gamma2d, beta2d)

    if d_pad != d_model:
        out2d = out2d[:, :d_model]
    return out2d.reshape(orig_shape)


def _reference(x, gamma, beta, eps):
    # Plain-JAX reference matching the PyTorch module (unbiased variance).
    xf = x.astype(jnp.float32)
    d_model = x.shape[-1]
    mean = jnp.mean(xf, axis=-1, keepdims=True)
    var = jnp.sum((xf - mean) ** 2, axis=-1, keepdims=True) / (d_model - 1)
    g = gamma.astype(jnp.float32)
    b = beta.astype(jnp.float32)
    return g * ((xf - mean) / jnp.sqrt(var + eps)) + b


if __name__ == "__main__":
    key = jax.random.PRNGKey(0)
    k1, k2, k3, k4 = jax.random.split(key, 4)

    # Test 1: small transformer-style shape; d_model=32 exercises the
    # pad-to-128 lane-dense path with a masked second pass.
    batch, seq, d_model = 2, 8, 32
    x = jax.random.normal(k1, (batch, seq, d_model), dtype=jnp.float32)
    # Offset-heavy input to exercise the cancellation-safe two-pass variance.
    x = x + 10.0
    gamma = jnp.ones((d_model,), dtype=jnp.float32)
    beta = jnp.zeros((d_model,), dtype=jnp.float32)

    out = jax.block_until_ready(layer_norm(x, gamma, beta, eps=1e-12))
    ref = _reference(x, gamma, beta, 1e-12)
    assert jnp.allclose(out, ref, atol=1e-5, rtol=1e-5), "mismatch (test 1)"

    # Test 2: non-divisible row count + lane-dense d_model exercises the
    # multi-step grid with a masked edge block and affine gamma/beta.
    b2, s2, d2 = 2, 13, 128
    x2 = jax.random.normal(k2, (b2, s2, d2), dtype=jnp.float32)
    gamma2 = 1.0 + 0.1 * jax.random.normal(k3, (d2,), dtype=jnp.float32)
    beta2 = 0.1 * jnp.arange(d2, dtype=jnp.float32)

    out2 = jax.block_until_ready(layer_norm(x2, gamma2, beta2, eps=1e-12, tile_rows=8))
    ref2 = _reference(x2, gamma2, beta2, 1e-12)
    assert jnp.allclose(out2, ref2, atol=1e-5, rtol=1e-5), "mismatch (test 2)"

    # Test 3: bf16 input exercises the f32-upcast path and sublane=16 tiles.
    b3, s3, d3 = 2, 16, 64
    x3 = jax.random.normal(k4, (b3, s3, d3), dtype=jnp.bfloat16)
    gamma3 = jnp.ones((d3,), dtype=jnp.bfloat16)
    beta3 = jnp.zeros((d3,), dtype=jnp.bfloat16)

    out3 = jax.block_until_ready(layer_norm(x3, gamma3, beta3, eps=1e-12))
    ref3 = _reference(x3, gamma3, beta3, 1e-12)
    assert jnp.allclose(out3.astype(jnp.float32), ref3, atol=5e-2, rtol=5e-2), \
        "mismatch (test 3, bf16)"

    print("KERNEL_OK")
</pallas_src>

<mosaic_0001>
module attributes {stable_mosaic.version = 11 : i64} {
  func.func @_layernorm_kernel(%arg0: i32, %arg1: memref<16x128xf32, #tpu.memory_space<vmem>>, %arg2: memref<1x128xf32, #tpu.memory_space<vmem>>, %arg3: memref<1x128xf32, #tpu.memory_space<vmem>>, %arg4: memref<16x128xf32, #tpu.memory_space<vmem>>) attributes {dimension_semantics = [#tpu.dimension_semantics<parallel>], iteration_bounds = array<i64: 1>, scalar_prefetch = 0 : i64, scratch_operands = 0 : i64, tpu.core_type = #tpu.core_type<tc>, window_params = [{transform_indices = @transform_0, window_bounds = array<i64: 16, 128>}, {pipeline_mode = #tpu.pipeline_mode<synchronous>, transform_indices = @transform_1, window_bounds = array<i64: 1, 128>}, {pipeline_mode = #tpu.pipeline_mode<synchronous>, transform_indices = @transform_2, window_bounds = array<i64: 1, 128>}, {transform_indices = @transform_3, window_bounds = array<i64: 16, 128>}]} {
    %c0 = arith.constant 0 : index
    %c0_0 = arith.constant 0 : index
    %0 = vector.load %arg1[%c0, %c0_0] : memref<16x128xf32, #tpu.memory_space<vmem>>, vector<16x128xf32>
    %cst = arith.constant dense<0.000000e+00> : vector<16xf32>
    %1 = vector.multi_reduction <add>, %0, %cst [1] : vector<16x128xf32> to vector<16xf32>
    %2 = vector.shape_cast %1 : vector<16xf32> to vector<16x1xf32>
    %cst_1 = arith.constant 3.125000e-02 : f32
    %3 = vector.broadcast %cst_1 : f32 to vector<16x1xf32>
    %4 = arith.mulf %2, %3 : vector<16x1xf32>
    %5 = vector.broadcast %4 : vector<16x1xf32> to vector<16x128xf32>
    %6 = arith.subf %0, %5 : vector<16x128xf32>
    %7 = tpu.iota {dimensions = array<i32: 1>} : vector<16x128xi32>
    %c32_i32 = arith.constant 32 : i32
    %8 = vector.broadcast %c32_i32 : i32 to vector<16x128xi32>
    %9 = arith.cmpi slt, %7, %8 : vector<16x128xi32>
    %cst_2 = arith.constant 0.000000e+00 : f32
    %10 = vector.broadcast %cst_2 : f32 to vector<16x128xf32>
    %11 = arith.select %9, %6, %10 : vector<16x128xi1>, vector<16x128xf32>
    %12 = arith.mulf %11, %11 : vector<16x128xf32>
    %cst_3 = arith.constant dense<0.000000e+00> : vector<16xf32>
    %13 = vector.multi_reduction <add>, %12, %cst_3 [1] : vector<16x128xf32> to vector<16xf32>
    %14 = vector.shape_cast %13 : vector<16xf32> to vector<16x1xf32>
    %cst_4 = arith.constant 0.0322580636 : f32
    %15 = vector.broadcast %cst_4 : f32 to vector<16x1xf32>
    %16 = arith.mulf %14, %15 : vector<16x1xf32>
    %cst_5 = arith.constant 9.99999996E-13 : f32
    %17 = vector.broadcast %cst_5 : f32 to vector<16x1xf32>
    %18 = arith.addf %16, %17 : vector<16x1xf32>
    %19 = math.rsqrt %18 : vector<16x1xf32>
    %c0_6 = arith.constant 0 : index
    %c0_7 = arith.constant 0 : index
    %20 = vector.load %arg2[%c0_6, %c0_7] : memref<1x128xf32, #tpu.memory_space<vmem>>, vector<1x128xf32>
    %c0_8 = arith.constant 0 : index
    %c0_9 = arith.constant 0 : index
    %21 = vector.load %arg3[%c0_8, %c0_9] : memref<1x128xf32, #tpu.memory_space<vmem>>, vector<1x128xf32>
    %22 = vector.broadcast %19 : vector<16x1xf32> to vector<16x128xf32>
    %23 = arith.mulf %11, %22 : vector<16x128xf32>
    %24 = vector.broadcast %20 : vector<1x128xf32> to vector<16x128xf32>
    %25 = arith.mulf %24, %23 : vector<16x128xf32>
    %26 = vector.broadcast %21 : vector<1x128xf32> to vector<16x128xf32>
    %27 = arith.addf %25, %26 : vector<16x128xf32>
    %c0_10 = arith.constant 0 : index
    %c0_11 = arith.constant 0 : index
    %28 = vector.load %arg4[%c0_10, %c0_11] : memref<16x128xf32, #tpu.memory_space<vmem>>, vector<16x128xf32>
    tpu.vector_store %arg4[%c0_10, %c0_11], %27 {strides = array<i32>} : memref<16x128xf32, #tpu.memory_space<vmem>>, vector<16x128xf32>,
    return
  }
  func.func @transform_0(%arg0: i32) -> (i32, i32) {
    %c0_i32 = arith.constant 0 : i32
    %c0_i32_0 = arith.constant 0 : i32
    return %arg0, %c0_i32 : i32, i32
  }
  func.func @transform_1(%arg0: i32) -> (i32, i32) {
    %c0_i32 = arith.constant 0 : i32
    %c0_i32_0 = arith.constant 0 : i32
    %c0_i32_1 = arith.constant 0 : i32
    return %c0_i32, %c0_i32_0 : i32, i32
  }
  func.func @transform_2(%arg0: i32) -> (i32, i32) {
    %c0_i32 = arith.constant 0 : i32
    %c0_i32_0 = arith.constant 0 : i32
    %c0_i32_1 = arith.constant 0 : i32
    return %c0_i32, %c0_i32_0 : i32, i32
  }
  func.func @transform_3(%arg0: i32) -> (i32, i32) {
    %c0_i32 = arith.constant 0 : i32
    %c0_i32_0 = arith.constant 0 : i32
    return %arg0, %c0_i32 : i32, i32
  }
}

</mosaic_0001>

<bundles_post_ra>
// kernel: tpu_custom_call.1
= control target key start
LH: loop header
LB: loop body
LE: loop exit
PB: predicated region body
PF: predicated region fallthrough
CT: control target
= control target key end

     0   :  { %8 = vsyncpa [#allocation3], 0  ;;  %s258_s0 = inlined_call_operand.hbm [shape: f32[16,128], index: 0, kind: input, shape index: {}]   ;;  %s259_s1 = inlined_call_operand.hbm [shape: f32[1,128], index: 1, kind: input, shape index: {}]   ;;  %s260_s2 = inlined_call_operand.vmem [shape: f32[1,128], index: 2, kind: input, shape index: {}]   ;;  %s261_s3 = inlined_call_operand.hbm [shape: f32[16,128], index: 3, kind: output, shape index: {}]  }
   0x1   :  { %9 = vsyncpa [#allocation6], 0 }
   0x2   :  { %10 = vsyncpa [#allocation4], 0  ;;  %s15_s14 = sshll.u32 %s258_s0, 4  ;;  %s215_s15 = smov [#allocation2]   ;;  %s16_s14 = int_to_ptr.hbm [resolvable:$true] %s15_s14 }
   0x3   :  { %s17_s16 = sshll.u32 %s215_s15, 4  ;;  %s29_s19 = sshll.u32 %s259_s1, 4  ;;  %s18_s16 = int_to_ptr.vmem [resolvable:$true] %s17_s16  ;;  %s30_s19 = int_to_ptr.hbm [resolvable:$true] %s29_s19 }
   0x4   :  { %s216_s20 = smov 128   ;;  %s217_s21 = smov 8  }
   0x5   :  { %23 = dma.hbm_to_vmem [thread:$0]  %s16_s14, 256, %s18_s16, [#allocation3], %s216_s20, %s216_s20, %s217_s21  }
   0x6   :  { %s218_s22 = smov [#allocation5]  }
   0x7   :  { %s31_s23 = sshll.u32 %s218_s22, 4  ;;  %s32_s23 = int_to_ptr.vmem [resolvable:$true] %s31_s23 }
   0x8   :  { %34 = dma.hbm_to_vmem [thread:$0]  %s30_s19, 16, %s32_s23, [#allocation6]  }
   0x9   :  { %209 = dma.done.wait [#allocation3], 256  }
   0xa   :  { %210 = vsyncadd [#allocation3], 4294967040 }
   0xb   :  { %211 = dma.done.wait [#allocation6], 16  }
   0xc   :  { %212 = vsyncadd [#allocation6], 4294967280  ;;  %v45_v0 = vld [vmem:[#allocation2] sm:$0xff]  ;;  %v46_v1 = vld [vmem:[#allocation2 + $0x8] sm:$0xff]  ;;  %v55_v2 = vlaneseq  ;;  %s219_s24 = smov [#allocation7]   ;;  %s112_s28 = sshll.u32 %s261_s3, 4  ;;  %s113_s28 = int_to_ptr.hbm [resolvable:$true] %s112_s28 }
   0xd   :  { %47 = vadd.xlane.f32.xlu0 %v45_v0  ;;  %v131_v28 = vld [vmem:[#allocation5] ss:$0 sm:$0xff]  ;;  %v132_v32 = vld [vmem:[%s260_s2] ss:$0 sm:$0xff]  ;;  %s110_s25 = sshll.u32 %s219_s24, 4  ;;  %s111_s25 = int_to_ptr.vmem [resolvable:$true] %s110_s25 }
   0xe   :  { %v56_v3 = vand.u32 127, %v55_v2 }
  0x10   :  { %vm57_vm0 = vcmp.lt.s32.totalorder %v56_v3, 32 }
  0x15   :  { %49 = vadd.xlane.f32.xlu0 %v46_v1 }
  0x80   :  { %v48_v4 = vpop.xlane.xlu0 %47 }
  0x81   :  { %v51_v5 = vmul.f32 0.03125, %v48_v4 }
  0x83   :  { %v53_v6 = vsub.f32 %v45_v0, %v51_v5 }
  0x85   :  { %v58_v7 = vsel %vm57_vm0, %v53_v6, 0.0 }
  0x86   :  { %v60_v8 = vmul.f32 %v58_v7, %v58_v7 }
  0x88   :  { %62 = vadd.xlane.f32.xlu1 %v60_v8  ;;  %v50_v9 = vpop.xlane.xlu0 %49 }
  0x89   :  { %v52_v10 = vmul.f32 0.03125, %v50_v9 }
  0x8b   :  { %v54_v11 = vsub.f32 %v46_v1, %v52_v10 }
  0x8d   :  { %v59_v12 = vsel %vm57_vm0, %v54_v11, 0.0 }
  0x8e   :  { %v61_v13 = vmul.f32 %v59_v12, %v59_v12 }
  0x90   :  { %64 = vadd.xlane.f32.xlu1 %v61_v13 }
  0xfb   :  { %v63_v14 = vpop.xlane.xlu1 %62 }
  0xfc   :  { %v66_v15 = vmul.f32 0.032258064, %v63_v14 }
  0xfe   :  { %v68_v16 = vadd.f32 1e-12, %v66_v15 }
 0x100   :  { %133 = vrsqrt.f32 %v68_v16  ;;  %vm76_vm2 = vweird.f32 %v68_v16 }
 0x103   :  { %v65_v17 = vpop.xlane.xlu1 %64 }
 0x104   :  { %v67_v18 = vmul.f32 0.032258064, %v65_v17 }
 0x106   :  { %v134_v19 = vpop.eup %133  ;;  %v69_v20 = vadd.f32 1e-12, %v67_v18 }
 0x107   :  { %v71_v21 = vmul.f32 %v134_v19, %v68_v16  ;;  %vm77_vm1 = vweird.f32 %v134_v19 }
 0x108   :  { %135 = vrsqrt.f32 %v69_v20  ;;  %vm78_vm3 = vmor %vm76_vm2, %vm77_vm1  ;;  %vm86_vm5 = vweird.f32 %v69_v20 }
 0x109   :  { %v72_v22 = vmul.f32 %v134_v19, %v71_v21 }
 0x10b   :  { %v73_v23 = vmul.f32 0.5, %v72_v22 }
 0x10d   :  { %v74_v24 = vsub.f32 1.5, %v73_v23 }
 0x10e   :  { %v136_v25 = vpop.eup %135 }
 0x10f   :  { %v75_v26 = vmul.f32 %v134_v19, %v74_v24  ;;  %v81_v27 = vmul.f32 %v136_v25, %v69_v20  ;;  %vm87_vm4 = vweird.f32 %v136_v25 }
 0x110   :  { %vm88_vm6 = vmor %vm86_vm5, %vm87_vm4 }
 0x111   :  { %v79_v29 = vsel %vm78_vm3, %v134_v19, %v75_v26  ;;  %v82_v30 = vmul.f32 %v136_v25, %v81_v27 }
 0x112   :  { %v92_v31 = vmul.f32 %v79_v29, %v58_v7 }
 0x113   :  { %v83_v33 = vmul.f32 0.5, %v82_v30 }
 0x114   :  { %v97_v34 = vmul.f32 %v131_v28, %v92_v31 }
 0x115   :  { %v84_v35 = vsub.f32 1.5, %v83_v33 }
 0x116   :  { %v102_v36 = vadd.f32 %v132_v32, %v97_v34 }
 0x117   :  { %v85_v37 = vmul.f32 %v136_v25, %v84_v35 }
 0x118   :  { %104 = vst [vmem:[#allocation7] sm:$0xff] %v102_v36 }
 0x119   :  { %v89_v38 = vsel %vm88_vm6, %v136_v25, %v85_v37 }
 0x11a   :  { %v93_v39 = vmul.f32 %v89_v38, %v59_v12 }
 0x11c   :  { %v98_v40 = vmul.f32 %v131_v28, %v93_v39 }
 0x11e   :  { %v103_v41 = vadd.f32 %v132_v32, %v98_v40 }
 0x120   :  { %105 = vst [vmem:[#allocation7 + $0x8] sm:$0xff] %v103_v41 }
 0x121   :  { %118 = dma.vmem_to_hbm [thread:$0]  %s111_s25, 256, %s113_s28, [#allocation4], %s216_s20, %s216_s20, %s217_s21  }
 0x122   :  { %213 = dma.done.wait [#allocation4], 256  }
 0x123   :  { %214 = vsyncadd [#allocation4], 4294967040 }
 0x124   :  { %123 = vsyncpa [#allocation3], 1 }
 0x125   :  { %124 = vsyncpa [#allocation6], 1 }
 0x126   :  { %125 = vsyncpa [#allocation4], 1 }

</bundles_post_ra>
